<compile_context>
chip_gen: v7x
topology: tpu7x:2x2x1
jax: 0.10.0
libtpu: 0.0.40
codegen_flags: <defaults>
</compile_context>

<pallas_src>
import functools
import math

import jax
import jax.numpy as jnp
from jax import lax
from jax.experimental import pallas as pl
from jax.experimental.pallas import tpu as pltpu


# ----------------------------------------------------------------------------
# Tile / VMEM selection
# ----------------------------------------------------------------------------
def _vmem_capacity_bytes():
    try:
        return int(pltpu.get_tpu_info().vmem_capacity_bytes)
    except Exception:
        return 64 * 1024 * 1024          # conservative (v7x per-TC) default


def _vmem_estimate(bs_t, q_t, hidden, g):
    inp = (bs_t * hidden * 2             # q tile (bf16)
           + q_t * hidden * 2            # a tile (bf16)
           + g * hidden * 4              # inv_sigma2 (f32)
           + bs_t * g * 4                # qconst
           + g * q_t * 4)                # aconst
    out = (bs_t * q_t * 4                # sim / acc
           + 2 * bs_t * 4                # rowmax + diag
           + 3 * bs_t * q_t              # int8 cts_pred / cts_dist / gmm_pred
           + g * bs_t * q_t * 4          # gmm logits (G-major)
           + 2 * bs_t * g * 4)           # rank sums / counts
    scratch = g * bs_t * hidden * 2      # scaled-LHS scratch (bf16)
    live = 2 * g * bs_t * q_t * 4        # live f32 per-component logits
    return 2 * (inp + out) + scratch + live     # x2 = double buffering


def _select_tiles(bs, q_tot, hidden, g, budget):
    bs_cands = [c for c in (256, 128, 64) if bs % c == 0] or [bs]
    multi = [c for c in bs_cands if bs // c >= 2]      # keep both TCs busy (v7x)
    bs_cands = multi or bs_cands
    q_cands = [c for c in (1024, 512, 256, 128) if q_tot % c == 0] or [q_tot]
    for bs_t in bs_cands:
        for q_t in q_cands:
            if _vmem_estimate(bs_t, q_t, hidden, g) <= budget:
                return bs_t, q_t
    return bs_cands[-1], q_cands[-1]


# ----------------------------------------------------------------------------
# Fused kernel: similarity heads + GMM heads + rank_mean statistics
#
#   grid = (bs tiles [parallel], Q tiles [arbitrary])
#   GMM quadratic form expanded algebraically so only the cross term needs the
#   MXU; the per-row constants (qconst, aconst) are precomputed in the wrapper.
# ----------------------------------------------------------------------------
def _emma_kernel(rm_ref, q_ref, a_ref, w_ref, qc_ref, ac_ref,
                 sim_ref, rmax_ref, diag_ref, pred_ref, dist_ref,
                 gmm_ref, gpred_ref, rsum_ref, rcnt_ref,
                 qw_scr,
                 *, rank_num, bs_t, q_t, is_pair, stacked):
    i = pl.program_id(0)
    j = pl.program_id(1)

    q = q_ref[...]                                   # (bs_t, H)  bf16
    a = a_ref[...]                                   # (q_t, H)   bf16
    dn = (((1,), (1,)), ((), ()))                    # contract on lane/H axis

    # Per-row-block init of accumulators carried across the (arbitrary) Q axis.
    @pl.when(j == 0)
    def _():
        rmax_ref[...] = jnp.full_like(rmax_ref, -jnp.inf)
        diag_ref[...] = jnp.zeros_like(diag_ref)
        rsum_ref[...] = jnp.zeros_like(rsum_ref)
        rcnt_ref[...] = jnp.zeros_like(rcnt_ref)

    if stacked:
        # Hoist the per-component LHS scaling off the Q axis: fill the
        # (G*bs_t, H) bf16 scratch once per row block.
        @pl.when(j == 0)
        def _():
            q32 = q.astype(jnp.float32)
            for g in range(rank_num):
                qw_scr[g * bs_t:(g + 1) * bs_t, :] = (
                    q32 * w_ref[g:g + 1, :]).astype(jnp.bfloat16)

    # ---------------- similarity head (bf16 MXU, f32 accumulate) -------------
    sim = lax.dot_general(q, a, dn, preferred_element_type=jnp.float32)

    rmax_ref[...] = jnp.maximum(rmax_ref[...],
                                jnp.max(sim, axis=1, keepdims=True))
    # cts_dist = floor((sim + 1) / 2 * rank_num)  (int8; rank_num < 128 assumed)
    dist_ref[...] = jnp.floor((sim + 1.0) * 0.5 * rank_num).astype(jnp.int8)

    # cts_pred = argmin_r |sim - rank_mean[r]| (rank_mean in SMEM; first index
    # wins on ties, like torch.argmin).
    best_d = jnp.abs(sim - rm_ref[0])
    best_r = jnp.zeros(sim.shape, jnp.int32)
    for r in range(1, rank_num):
        d = jnp.abs(sim - rm_ref[r])
        upd = d < best_d
        best_r = jnp.where(upd, r, best_r)
        best_d = jnp.where(upd, d, best_d)
    pred_ref[...] = best_r.astype(jnp.int8)

    # ---- 'acc' output: sim with the pair diagonal zeroed, fused in-kernel.
    #      The true diagonal goes to a (bs,1) side-band so cts_logits can be
    #      rebuilt without ever storing raw sim separately.
    if is_pair:
        rows = lax.broadcasted_iota(jnp.int32, (bs_t, q_t), 0) + i * bs_t
        cols = lax.broadcasted_iota(jnp.int32, (bs_t, q_t), 1) + j * q_t
        is_diag = rows == cols
        diag_ref[...] = diag_ref[...] + jnp.sum(
            jnp.where(is_diag, sim, 0.0), axis=1, keepdims=True)
        sim_ref[...] = jnp.where(is_diag, 0.0, sim)
    else:
        sim_ref[...] = sim

    # ---------------- Gaussian-mixture logits --------------------------------
    qc = qc_ref[...]                                 # (bs_t, G) f32
    logits = []
    if stacked:
        # Single stacked (G*bs_t, H) x (H, q_t) MXU matmul reusing the RHS push.
        cross = lax.dot_general(qw_scr[...], a, dn,
                                preferred_element_type=jnp.float32)
        for g in range(rank_num):
            logits.append(cross[g * bs_t:(g + 1) * bs_t, :]
                          + qc[:, g:g + 1] + ac_ref[g:g + 1, :])
    else:
        # Tiny / unaligned row tiles: per-component matmul (still bf16 MXU).
        q32 = q.astype(jnp.float32)
        for g in range(rank_num):
            lhs = (q32 * w_ref[g:g + 1, :]).astype(jnp.bfloat16)
            cross = lax.dot_general(lhs, a, dn,
                                    preferred_element_type=jnp.float32)
            logits.append(cross + qc[:, g:g + 1] + ac_ref[g:g + 1, :])

    # max over components, store max-normalized logits (matches the torch
    # reference, which returns logits - logits.max(dim=-1)).
    m = logits[0]
    for g in range(1, rank_num):
        m = jnp.maximum(m, logits[g])
    for g in range(rank_num):
        gmm_ref[g, :, :] = logits[g] - m

    # argmax over components (== argmax of softmax; first index on ties).
    best_v = logits[0]
    best_g = jnp.zeros(m.shape, jnp.int32)
    for g in range(1, rank_num):
        upd = logits[g] > best_v
        best_g = jnp.where(upd, g, best_g)
        best_v = jnp.where(upd, logits[g], best_v)
    gpred_ref[...] = best_g.astype(jnp.int8)

    # ---- fused rank_mean statistics: per-row, per-component sums / counts.
    for g in range(rank_num):
        mg = best_g == g
        rsum_ref[:, g:g + 1] = rsum_ref[:, g:g + 1] + jnp.sum(
            jnp.where(mg, sim, 0.0), axis=1, keepdims=True)
        rcnt_ref[:, g:g + 1] = rcnt_ref[:, g:g + 1] + jnp.sum(
            mg.astype(jnp.float32), axis=1, keepdims=True)


def emma_heads_pallas(sent_q, all_feature, rank_mean, mu, lg_sigma2, pi,
                      rank_num, is_pair):
    bs, hidden = sent_q.shape
    q_tot = all_feature.shape[0]
    g = rank_num

    sentence_q = lax.stop_gradient(sent_q)

    # Grid-invariant GMM terms (tiny: O(G*H), O(bs*G), O(Q*G)), kept in f32.
    inv_s = jnp.exp(-lg_sigma2)                               # (G, H) = 1/sigma^2
    mu_w = mu * inv_s                                         # (G, H)
    log_pi = jax.nn.log_softmax(pi)                           # (G,)
    c_g = log_pi - 0.5 * (hidden * math.log(2.0 * math.pi)
                          + jnp.sum(lg_sigma2, axis=-1)
                          + jnp.sum(mu * mu_w, axis=-1))      # (G,)
    qconst = (c_g[None, :]
              - 0.5 * ((sentence_q * sentence_q) @ inv_s.T)
              + sentence_q @ mu_w.T)                          # (bs, G)
    aconst = (-0.5 * ((all_feature * all_feature) @ inv_s.T)
              - all_feature @ mu_w.T).T                       # (G, Q)

    # bf16 MXU inputs (f32 accumulation inside the kernel).
    q_bf = sent_q.astype(jnp.bfloat16)
    a_bf = all_feature.astype(jnp.bfloat16)

    vmem_cap = _vmem_capacity_bytes()
    vmem_limit = (vmem_cap * 3) // 4
    bs_t, q_t = _select_tiles(bs, q_tot, hidden, g, vmem_limit // 2)
    grid = (bs // bs_t, q_tot // q_t)
    stacked = (bs_t % 8 == 0)

    kernel = functools.partial(_emma_kernel, rank_num=g, bs_t=bs_t, q_t=q_t,
                               is_pair=is_pair, stacked=stacked)

    grid_spec = pltpu.PrefetchScalarGridSpec(
        num_scalar_prefetch=1,                     # rank_mean -> SMEM scalars
        grid=grid,
        in_specs=[
            pl.BlockSpec((bs_t, hidden), lambda i, j, rm: (i, 0)),   # sent_q bf16
            pl.BlockSpec((q_t, hidden), lambda i, j, rm: (j, 0)),    # all_feature bf16
            pl.BlockSpec((g, hidden), lambda i, j, rm: (0, 0)),      # inv_sigma2
            pl.BlockSpec((bs_t, g), lambda i, j, rm: (i, 0)),        # qconst
            pl.BlockSpec((g, q_t), lambda i, j, rm: (0, j)),         # aconst
        ],
        out_specs=(
            pl.BlockSpec((bs_t, q_t), lambda i, j, rm: (i, j)),       # sim / acc
            pl.BlockSpec((bs_t, 1), lambda i, j, rm: (i, 0)),         # row max
            pl.BlockSpec((bs_t, 1), lambda i, j, rm: (i, 0)),         # diagonal
            pl.BlockSpec((bs_t, q_t), lambda i, j, rm: (i, j)),       # cts_pred i8
            pl.BlockSpec((bs_t, q_t), lambda i, j, rm: (i, j)),       # cts_dist i8
            pl.BlockSpec((g, bs_t, q_t), lambda i, j, rm: (0, i, j)), # gmm logits
            pl.BlockSpec((bs_t, q_t), lambda i, j, rm: (i, j)),       # gmm_pred i8
            pl.BlockSpec((bs_t, g), lambda i, j, rm: (i, 0)),         # rank sums
            pl.BlockSpec((bs_t, g), lambda i, j, rm: (i, 0)),         # rank counts
        ),
        scratch_shapes=[pltpu.VMEM((g * bs_t, hidden), jnp.bfloat16)],
    )

    return pl.pallas_call(
        kernel,
        out_shape=(
            jax.ShapeDtypeStruct((bs, q_tot), jnp.float32),
            jax.ShapeDtypeStruct((bs, 1), jnp.float32),
            jax.ShapeDtypeStruct((bs, 1), jnp.float32),
            jax.ShapeDtypeStruct((bs, q_tot), jnp.int8),
            jax.ShapeDtypeStruct((bs, q_tot), jnp.int8),
            jax.ShapeDtypeStruct((g, bs, q_tot), jnp.float32),    # G-major, lane-dense
            jax.ShapeDtypeStruct((bs, q_tot), jnp.int8),
            jax.ShapeDtypeStruct((bs, g), jnp.float32),
            jax.ShapeDtypeStruct((bs, g), jnp.float32),
        ),
        grid_spec=grid_spec,
        compiler_params=pltpu.CompilerParams(
            dimension_semantics=("parallel", "arbitrary"),
            vmem_limit_bytes=vmem_limit),
    )(rank_mean, q_bf, a_bf, inv_s, qconst, aconst)


# ----------------------------------------------------------------------------
# Plain-JAX glue reproducing EMMA.forward semantics
# ----------------------------------------------------------------------------
def _encode(emb, ids, mask):
    # TODO(synk): EMMAEncoder (pretrained transformer, do_mlm path) replaced by a
    # deterministic stand-in: embedding lookup + masked mean pool + L2 norm.
    h = emb[ids]                                       # (bs, S, H)
    mask_f = mask.astype(jnp.float32)[..., None]
    pooled = (h * mask_f).sum(axis=1) / jnp.clip(mask_f.sum(axis=1), 1e-9)
    return pooled / jnp.linalg.norm(pooled, axis=-1, keepdims=True)


def emma_forward(params, state, inputs, cfg, is_pair=True):
    pad_id = cfg["pad"]
    rank_num = cfg["rank_num"]
    update_mean = cfg["update_mean"]
    m = cfg["m"]

    emb_q, emb_k = params["emb_q"], params["emb_k"]
    mu, lg_sigma2, pi = params["mu"], params["lg_sigma2"], params["pi"]
    queue, queue_ptr, rank_mean = state["queue"], state["queue_ptr"], state["rank_mean"]

    padding_mask = inputs != pad_id

    # momentum update of the key encoder (no mlm head in this synthetic setup)
    emb_k_new = emb_k * m + emb_q * (1.0 - m)
    sent_q = _encode(emb_q, inputs, padding_mask)
    sent_k = lax.stop_gradient(_encode(emb_k_new, inputs, padding_mask))

    all_feature = jnp.concatenate([sent_k, queue], axis=0)       # (bs+K, H)
    bs, hidden = sent_q.shape
    q_tot = all_feature.shape[0]
    k_size = queue.shape[0]

    # ---- one fused Pallas kernel: sim / cts / gmm heads + rank statistics ----
    (acc_sim, row_max, diag, cts_pred, cts_dist,
     gmm_logits, gmm_pred, rank_sum, rank_cnt) = emma_heads_pallas(
        sent_q, all_feature, rank_mean, mu, lg_sigma2, pi, rank_num, is_pair)

    # cts_logits = sim - rowmax: rebuild the true diagonal from the side-band in
    # one fused XLA elementwise pass (raw sim is never stored separately).
    row_ids = jnp.arange(bs, dtype=jnp.int32)[:, None]
    col_ids = jnp.arange(q_tot, dtype=jnp.int32)[None, :]
    if is_pair:
        sim_full = jnp.where(row_ids == col_ids, diag, acc_sim)
    else:
        sim_full = acc_sim
    cts_logits = sim_full - row_max

    # fused rank_mean EMA update (only tiny (bs, G) reductions in XLA).
    sums = jnp.sum(rank_sum, axis=0)
    counts = jnp.sum(rank_cnt, axis=0)
    update_mask = (counts != 0).astype(jnp.float32)
    cur_rank_mean = sums / (counts + 1e-12)
    new_rank_mean = ((1.0 - update_mask * update_mean) * rank_mean
                     + update_mask * update_mean * cur_rank_mean)

    logits_dict = {}
    pair_label = None
    golden_mask = None
    if is_pair:
        ar = jnp.arange(bs)
        pair_label = jnp.concatenate([ar[bs // 2:], ar[:bs // 2]])
        golden_labels = ar[:, None] == pair_label[None, :]
        golden_mask = jnp.concatenate(
            [golden_labels, jnp.zeros((bs, k_size), dtype=bool)], axis=-1)

    gmm_label = cts_pred
    cts_label = gmm_pred
    if golden_mask is not None:
        gmm_mask = (row_ids == col_ids) | golden_mask
        gmm_label = jnp.where(gmm_mask, jnp.int8(rank_num - 1), cts_pred)
        cts_label = jnp.where(golden_mask, jnp.int8(rank_num - 1), gmm_pred)

    # reproduce torch in-place aliasing: gmm.pred == cts.label, gmm.label == cts.pred.
    # NOTE: gmm logits are emitted lane-dense as (G, bs, Q); downstream losses
    # should reduce over axis 0 (no relayout pass is performed here).
    logits_dict["gmm"] = {"logits": gmm_logits, "pred": cts_label, "label": gmm_label}
    logits_dict["cts"] = {"logits": cts_logits, "pred": gmm_label,
                          "label": cts_label, "dist": cts_dist}
    if is_pair:
        logits_dict["acc"] = {"pred": acc_sim, "label": pair_label}

    # dequeue & enqueue (buffer updates returned as new state)
    new_queue = lax.dynamic_update_slice(queue, sent_k, (queue_ptr, jnp.int32(0)))
    new_ptr = (queue_ptr + bs) % cfg["K"]

    new_state = {"queue": new_queue, "queue_ptr": new_ptr,
                 "rank_mean": new_rank_mean, "emb_k": emb_k_new}
    return logits_dict, new_state


# ----------------------------------------------------------------------------
if __name__ == "__main__":
    bs, seq, hidden, vocab = 4, 8, 32, 50
    K, rank_num = 8, 4
    cfg = {"pad": 0, "K": K, "m": 0.999, "rank_num": rank_num, "update_mean": 0.1}

    key = jax.random.PRNGKey(0)
    k0, k1, k2, k3, k4, k5 = jax.random.split(key, 6)

    params = {
        "emb_q": jax.random.normal(k0, (vocab, hidden), jnp.float32) * 0.02,
        "emb_k": jax.random.normal(k1, (vocab, hidden), jnp.float32) * 0.02,
        "mu": jax.random.normal(k2, (rank_num, hidden), jnp.float32),
        "lg_sigma2": jax.random.normal(k3, (rank_num, hidden), jnp.float32),
        "pi": jnp.ones((rank_num,), jnp.float32),
    }
    queue = jax.random.normal(k4, (K, hidden), jnp.float32)
    queue = queue / jnp.linalg.norm(queue, axis=1, keepdims=True)
    state = {
        "queue": queue,
        "queue_ptr": jnp.int32(0),
        "rank_mean": jnp.zeros((rank_num,), jnp.float32),
    }

    inputs = jax.random.randint(k5, (bs, seq), 1, vocab, dtype=jnp.int32)
    inputs = inputs.at[:, -2:].set(cfg["pad"])   # some padding tokens

    logits_dict, new_state = emma_forward(params, state, inputs, cfg, is_pair=True)
    jax.block_until_ready((logits_dict, new_state))
    print("KERNEL_OK")
</pallas_src>

<mosaic_0001>
module attributes {stable_mosaic.version = 11 : i64} {
  func.func @_emma_kernel(%arg0: i32, %arg1: i32, %arg2: memref<4xf32, #tpu.memory_space<smem>>, %arg3: memref<4x32xbf16, #tpu.memory_space<vmem>>, %arg4: memref<12x32xbf16, #tpu.memory_space<vmem>>, %arg5: memref<4x32xf32, #tpu.memory_space<vmem>>, %arg6: memref<4x4xf32, #tpu.memory_space<vmem>>, %arg7: memref<4x12xf32, #tpu.memory_space<vmem>>, %arg8: memref<4x12xf32, #tpu.memory_space<vmem>>, %arg9: memref<4x1xf32, #tpu.memory_space<vmem>>, %arg10: memref<4x1xf32, #tpu.memory_space<vmem>>, %arg11: memref<4x12xi8, #tpu.memory_space<vmem>>, %arg12: memref<4x12xi8, #tpu.memory_space<vmem>>, %arg13: memref<4x4x12xf32, #tpu.memory_space<vmem>>, %arg14: memref<4x12xi8, #tpu.memory_space<vmem>>, %arg15: memref<4x4xf32, #tpu.memory_space<vmem>>, %arg16: memref<4x4xf32, #tpu.memory_space<vmem>>, %arg17: memref<16x32xbf16, #tpu.memory_space<vmem>>) attributes {dimension_semantics = [#tpu.dimension_semantics<parallel>, #tpu.dimension_semantics<arbitrary>], iteration_bounds = array<i64: 1, 1>, scalar_prefetch = 1 : i64, scratch_operands = 1 : i64, tpu.core_type = #tpu.core_type<tc>, window_params = [{transform_indices = @transform_0, window_bounds = array<i64: 4, 32>}, {transform_indices = @transform_1, window_bounds = array<i64: 12, 32>}, {pipeline_mode = #tpu.pipeline_mode<synchronous>, transform_indices = @transform_2, window_bounds = array<i64: 4, 32>}, {transform_indices = @transform_3, window_bounds = array<i64: 4, 4>}, {transform_indices = @transform_4, window_bounds = array<i64: 4, 12>}, {transform_indices = @transform_5, window_bounds = array<i64: 4, 12>}, {transform_indices = @transform_6, window_bounds = array<i64: 4, 1>}, {transform_indices = @transform_7, window_bounds = array<i64: 4, 1>}, {transform_indices = @transform_8, window_bounds = array<i64: 4, 12>}, {transform_indices = @transform_9, window_bounds = array<i64: 4, 12>}, {transform_indices = @transform_10, window_bounds = array<i64: 4, 4, 12>}, {transform_indices = @transform_11, window_bounds = array<i64: 4, 12>}, {transform_indices = @transform_12, window_bounds = array<i64: 4, 4>}, {transform_indices = @transform_13, window_bounds = array<i64: 4, 4>}]} {
    %c0 = arith.constant 0 : index
    %c0_0 = arith.constant 0 : index
    %0 = vector.load %arg3[%c0, %c0_0] : memref<4x32xbf16, #tpu.memory_space<vmem>>, vector<4x32xbf16>
    %c0_1 = arith.constant 0 : index
    %c0_2 = arith.constant 0 : index
    %1 = vector.load %arg4[%c0_1, %c0_2] : memref<12x32xbf16, #tpu.memory_space<vmem>>, vector<12x32xbf16>
    %c0_i32 = arith.constant 0 : i32
    %2 = arith.cmpi eq, %arg1, %c0_i32 : i32
    %3 = arith.extui %2 : i1 to i32
    %c0_i32_3 = arith.constant 0 : i32
    %4 = arith.cmpi ne, %3, %c0_i32_3 : i32
    scf.if %4 {
      %cst_115 = arith.constant 0xFF800000 : f32
      %212 = vector.broadcast %cst_115 : f32 to vector<4x1xf32>
      %c0_116 = arith.constant 0 : index
      %c0_117 = arith.constant 0 : index
      %213 = vector.load %arg9[%c0_116, %c0_117] : memref<4x1xf32, #tpu.memory_space<vmem>>, vector<4x1xf32>
      tpu.vector_store %arg9[%c0_116, %c0_117], %212 {strides = array<i32>} : memref<4x1xf32, #tpu.memory_space<vmem>>, vector<4x1xf32>,
      %cst_118 = arith.constant 0.000000e+00 : f32
      %214 = vector.broadcast %cst_118 : f32 to vector<4x1xf32>
      %c0_119 = arith.constant 0 : index
      %c0_120 = arith.constant 0 : index
      %215 = vector.load %arg10[%c0_119, %c0_120] : memref<4x1xf32, #tpu.memory_space<vmem>>, vector<4x1xf32>
      tpu.vector_store %arg10[%c0_119, %c0_120], %214 {strides = array<i32>} : memref<4x1xf32, #tpu.memory_space<vmem>>, vector<4x1xf32>,
      %cst_121 = arith.constant 0.000000e+00 : f32
      %216 = vector.broadcast %cst_121 : f32 to vector<4x4xf32>
      %c0_122 = arith.constant 0 : index
      %c0_123 = arith.constant 0 : index
      %217 = vector.load %arg15[%c0_122, %c0_123] : memref<4x4xf32, #tpu.memory_space<vmem>>, vector<4x4xf32>
      tpu.vector_store %arg15[%c0_122, %c0_123], %216 {strides = array<i32>} : memref<4x4xf32, #tpu.memory_space<vmem>>, vector<4x4xf32>,
      %cst_124 = arith.constant 0.000000e+00 : f32
      %218 = vector.broadcast %cst_124 : f32 to vector<4x4xf32>
      %c0_125 = arith.constant 0 : index
      %c0_126 = arith.constant 0 : index
      %219 = vector.load %arg16[%c0_125, %c0_126] : memref<4x4xf32, #tpu.memory_space<vmem>>, vector<4x4xf32>
      tpu.vector_store %arg16[%c0_125, %c0_126], %218 {strides = array<i32>} : memref<4x4xf32, #tpu.memory_space<vmem>>, vector<4x4xf32>,
    } else {
    }
    %cst = arith.constant dense<0.000000e+00> : vector<4x12xf32>
    %5 = tpu.matmul %0, %1, %cst {dimension_numbers = #tpu.dot_dimension_numbers<[1], [1], [0], [0], [0, 0, 1, 0], [], []>} : vector<4x32xbf16>, vector<12x32xbf16>, vector<4x12xf32> -> vector<4x12xf32>
    %c0_4 = arith.constant 0 : index
    %c0_5 = arith.constant 0 : index
    %6 = vector.load %arg9[%c0_4, %c0_5] : memref<4x1xf32, #tpu.memory_space<vmem>>, vector<4x1xf32>
    %cst_6 = arith.constant dense<0xFF800000> : vector<4xf32>
    %7 = vector.multi_reduction <maximumf>, %5, %cst_6 [1] : vector<4x12xf32> to vector<4xf32>
    %8 = vector.shape_cast %7 : vector<4xf32> to vector<4x1xf32>
    %9 = arith.maximumf %6, %8 : vector<4x1xf32>
    %c0_7 = arith.constant 0 : index
    %c0_8 = arith.constant 0 : index
    %10 = vector.load %arg9[%c0_7, %c0_8] : memref<4x1xf32, #tpu.memory_space<vmem>>, vector<4x1xf32>
    tpu.vector_store %arg9[%c0_7, %c0_8], %9 {strides = array<i32>} : memref<4x1xf32, #tpu.memory_space<vmem>>, vector<4x1xf32>,
    %cst_9 = arith.constant 1.000000e+00 : f32
    %11 = vector.broadcast %cst_9 : f32 to vector<4x12xf32>
    %12 = arith.addf %5, %11 : vector<4x12xf32>
    %cst_10 = arith.constant 5.000000e-01 : f32
    %13 = vector.broadcast %cst_10 : f32 to vector<4x12xf32>
    %14 = arith.mulf %12, %13 : vector<4x12xf32>
    %cst_11 = arith.constant 4.000000e+00 : f32
    %15 = vector.broadcast %cst_11 : f32 to vector<4x12xf32>
    %16 = arith.mulf %14, %15 : vector<4x12xf32>
    %17 = math.floor %16 : vector<4x12xf32>
    %18 = arith.fptosi %17 : vector<4x12xf32> to vector<4x12xi8>
    %c0_12 = arith.constant 0 : index
    %c0_13 = arith.constant 0 : index
    %19 = vector.load %arg12[%c0_12, %c0_13] : memref<4x12xi8, #tpu.memory_space<vmem>>, vector<4x12xi8>
    tpu.vector_store %arg12[%c0_12, %c0_13], %18 {strides = array<i32>} : memref<4x12xi8, #tpu.memory_space<vmem>>, vector<4x12xi8>,
    %c0_14 = arith.constant 0 : index
    %20 = memref.load %arg2[%c0_14] : memref<4xf32, #tpu.memory_space<smem>>
    %21 = vector.broadcast %20 : f32 to vector<4x12xf32>
    %22 = arith.subf %5, %21 : vector<4x12xf32>
    %23 = math.absf %22 : vector<4x12xf32>
    %c0_i32_15 = arith.constant 0 : i32
    %24 = vector.broadcast %c0_i32_15 : i32 to vector<4x12xi32>
    %c1 = arith.constant 1 : index
    %25 = memref.load %arg2[%c1] : memref<4xf32, #tpu.memory_space<smem>>
    %26 = vector.broadcast %25 : f32 to vector<4x12xf32>
    %27 = arith.subf %5, %26 : vector<4x12xf32>
    %28 = math.absf %27 : vector<4x12xf32>
    %29 = arith.cmpf olt, %28, %23 : vector<4x12xf32>
    %c1_i32 = arith.constant 1 : i32
    %30 = vector.broadcast %c1_i32 : i32 to vector<4x12xi32>
    %31 = arith.select %29, %30, %24 : vector<4x12xi1>, vector<4x12xi32>
    %32 = arith.select %29, %28, %23 : vector<4x12xi1>, vector<4x12xf32>
    %c2 = arith.constant 2 : index
    %33 = memref.load %arg2[%c2] : memref<4xf32, #tpu.memory_space<smem>>
    %34 = vector.broadcast %33 : f32 to vector<4x12xf32>
    %35 = arith.subf %5, %34 : vector<4x12xf32>
    %36 = math.absf %35 : vector<4x12xf32>
    %37 = arith.cmpf olt, %36, %32 : vector<4x12xf32>
    %c2_i32 = arith.constant 2 : i32
    %38 = vector.broadcast %c2_i32 : i32 to vector<4x12xi32>
    %39 = arith.select %37, %38, %31 : vector<4x12xi1>, vector<4x12xi32>
    %40 = arith.select %37, %36, %32 : vector<4x12xi1>, vector<4x12xf32>
    %c3 = arith.constant 3 : index
    %41 = memref.load %arg2[%c3] : memref<4xf32, #tpu.memory_space<smem>>
    %42 = vector.broadcast %41 : f32 to vector<4x12xf32>
    %43 = arith.subf %5, %42 : vector<4x12xf32>
    %44 = math.absf %43 : vector<4x12xf32>
    %45 = arith.cmpf olt, %44, %40 : vector<4x12xf32>
    %c3_i32 = arith.constant 3 : i32
    %46 = vector.broadcast %c3_i32 : i32 to vector<4x12xi32>
    %47 = arith.select %45, %46, %39 : vector<4x12xi1>, vector<4x12xi32>
    %48 = arith.trunci %47 : vector<4x12xi32> to vector<4x12xi8>
    %c0_16 = arith.constant 0 : index
    %c0_17 = arith.constant 0 : index
    %49 = vector.load %arg11[%c0_16, %c0_17] : memref<4x12xi8, #tpu.memory_space<vmem>>, vector<4x12xi8>
    tpu.vector_store %arg11[%c0_16, %c0_17], %48 {strides = array<i32>} : memref<4x12xi8, #tpu.memory_space<vmem>>, vector<4x12xi8>,
    %50 = tpu.iota {dimensions = array<i32: 0>} : vector<4x12xi32>
    %c4_i32 = arith.constant 4 : i32
    %51 = arith.muli %arg0, %c4_i32 : i32
    %52 = vector.broadcast %51 : i32 to vector<4x12xi32>
    %53 = arith.addi %50, %52 : vector<4x12xi32>
    %54 = tpu.iota {dimensions = array<i32: 1>} : vector<4x12xi32>
    %c12_i32 = arith.constant 12 : i32
    %55 = arith.muli %arg1, %c12_i32 : i32
    %56 = vector.broadcast %55 : i32 to vector<4x12xi32>
    %57 = arith.addi %54, %56 : vector<4x12xi32>
    %58 = arith.cmpi eq, %53, %57 : vector<4x12xi32>
    %c0_18 = arith.constant 0 : index
    %c0_19 = arith.constant 0 : index
    %59 = vector.load %arg10[%c0_18, %c0_19] : memref<4x1xf32, #tpu.memory_space<vmem>>, vector<4x1xf32>
    %cst_20 = arith.constant 0.000000e+00 : f32
    %60 = vector.broadcast %cst_20 : f32 to vector<4x12xf32>
    %61 = arith.select %58, %5, %60 : vector<4x12xi1>, vector<4x12xf32>
    %cst_21 = arith.constant dense<0.000000e+00> : vector<4xf32>
    %62 = vector.multi_reduction <add>, %61, %cst_21 [1] : vector<4x12xf32> to vector<4xf32>
    %63 = vector.shape_cast %62 : vector<4xf32> to vector<4x1xf32>
    %64 = arith.addf %59, %63 : vector<4x1xf32>
    %c0_22 = arith.constant 0 : index
    %c0_23 = arith.constant 0 : index
    %65 = vector.load %arg10[%c0_22, %c0_23] : memref<4x1xf32, #tpu.memory_space<vmem>>, vector<4x1xf32>
    tpu.vector_store %arg10[%c0_22, %c0_23], %64 {strides = array<i32>} : memref<4x1xf32, #tpu.memory_space<vmem>>, vector<4x1xf32>,
    %cst_24 = arith.constant 0.000000e+00 : f32
    %66 = vector.broadcast %cst_24 : f32 to vector<4x12xf32>
    %67 = arith.select %58, %66, %5 : vector<4x12xi1>, vector<4x12xf32>
    %c0_25 = arith.constant 0 : index
    %c0_26 = arith.constant 0 : index
    %68 = vector.load %arg8[%c0_25, %c0_26] : memref<4x12xf32, #tpu.memory_space<vmem>>, vector<4x12xf32>
    tpu.vector_store %arg8[%c0_25, %c0_26], %67 {strides = array<i32>} : memref<4x12xf32, #tpu.memory_space<vmem>>, vector<4x12xf32>,
    %c0_27 = arith.constant 0 : index
    %c0_28 = arith.constant 0 : index
    %69 = vector.load %arg6[%c0_27, %c0_28] : memref<4x4xf32, #tpu.memory_space<vmem>>, vector<4x4xf32>
    %70 = arith.extf %0 : vector<4x32xbf16> to vector<4x32xf32>
    %c0_29 = arith.constant 0 : index
    %c0_30 = arith.constant 0 : index
    %71 = vector.load %arg5[%c0_29, %c0_30] : memref<4x32xf32, #tpu.memory_space<vmem>>, vector<1x32xf32>
    %72 = vector.broadcast %71 : vector<1x32xf32> to vector<4x32xf32>
    %73 = arith.mulf %70, %72 : vector<4x32xf32>
    %74 = arith.truncf %73 : vector<4x32xf32> to vector<4x32xbf16>
    %cst_31 = arith.constant dense<0.000000e+00> : vector<4x12xf32>
    %75 = tpu.matmul %74, %1, %cst_31 {dimension_numbers = #tpu.dot_dimension_numbers<[1], [1], [0], [0], [0, 0, 1, 0], [], []>} : vector<4x32xbf16>, vector<12x32xbf16>, vector<4x12xf32> -> vector<4x12xf32>
    %76 = vector.extract_strided_slice %69 {offsets = [0, 0], sizes = [4, 1], strides = [1, 1]} : vector<4x4xf32> to vector<4x1xf32>
    %77 = vector.broadcast %76 : vector<4x1xf32> to vector<4x12xf32>
    %78 = arith.addf %75, %77 : vector<4x12xf32>
    %c0_32 = arith.constant 0 : index
    %c0_33 = arith.constant 0 : index
    %79 = vector.load %arg7[%c0_32, %c0_33] : memref<4x12xf32, #tpu.memory_space<vmem>>, vector<1x12xf32>
    %80 = vector.broadcast %79 : vector<1x12xf32> to vector<4x12xf32>
    %81 = arith.addf %78, %80 : vector<4x12xf32>
    %c1_34 = arith.constant 1 : index
    %c0_35 = arith.constant 0 : index
    %82 = vector.load %arg5[%c1_34, %c0_35] : memref<4x32xf32, #tpu.memory_space<vmem>>, vector<1x32xf32>
    %83 = vector.broadcast %82 : vector<1x32xf32> to vector<4x32xf32>
    %84 = arith.mulf %70, %83 : vector<4x32xf32>
    %85 = arith.truncf %84 : vector<4x32xf32> to vector<4x32xbf16>
    %cst_36 = arith.constant dense<0.000000e+00> : vector<4x12xf32>
    %86 = tpu.matmul %85, %1, %cst_36 {dimension_numbers = #tpu.dot_dimension_numbers<[1], [1], [0], [0], [0, 0, 1, 0], [], []>} : vector<4x32xbf16>, vector<12x32xbf16>, vector<4x12xf32> -> vector<4x12xf32>
    %87 = vector.extract_strided_slice %69 {offsets = [0, 1], sizes = [4, 1], strides = [1, 1]} : vector<4x4xf32> to vector<4x1xf32>
    %88 = vector.broadcast %87 : vector<4x1xf32> to vector<4x12xf32>
    %89 = arith.addf %86, %88 : vector<4x12xf32>
    %c1_37 = arith.constant 1 : index
    %c0_38 = arith.constant 0 : index
    %90 = vector.load %arg7[%c1_37, %c0_38] : memref<4x12xf32, #tpu.memory_space<vmem>>, vector<1x12xf32>
    %91 = vector.broadcast %90 : vector<1x12xf32> to vector<4x12xf32>
    %92 = arith.addf %89, %91 : vector<4x12xf32>
    %c2_39 = arith.constant 2 : index
    %c0_40 = arith.constant 0 : index
    %93 = vector.load %arg5[%c2_39, %c0_40] : memref<4x32xf32, #tpu.memory_space<vmem>>, vector<1x32xf32>
    %94 = vector.broadcast %93 : vector<1x32xf32> to vector<4x32xf32>
    %95 = arith.mulf %70, %94 : vector<4x32xf32>
    %96 = arith.truncf %95 : vector<4x32xf32> to vector<4x32xbf16>
    %cst_41 = arith.constant dense<0.000000e+00> : vector<4x12xf32>
    %97 = tpu.matmul %96, %1, %cst_41 {dimension_numbers = #tpu.dot_dimension_numbers<[1], [1], [0], [0], [0, 0, 1, 0], [], []>} : vector<4x32xbf16>, vector<12x32xbf16>, vector<4x12xf32> -> vector<4x12xf32>
    %98 = vector.extract_strided_slice %69 {offsets = [0, 2], sizes = [4, 1], strides = [1, 1]} : vector<4x4xf32> to vector<4x1xf32>
    %99 = vector.broadcast %98 : vector<4x1xf32> to vector<4x12xf32>
    %100 = arith.addf %97, %99 : vector<4x12xf32>
    %c2_42 = arith.constant 2 : index
    %c0_43 = arith.constant 0 : index
    %101 = vector.load %arg7[%c2_42, %c0_43] : memref<4x12xf32, #tpu.memory_space<vmem>>, vector<1x12xf32>
    %102 = vector.broadcast %101 : vector<1x12xf32> to vector<4x12xf32>
    %103 = arith.addf %100, %102 : vector<4x12xf32>
    %c3_44 = arith.constant 3 : index
    %c0_45 = arith.constant 0 : index
    %104 = vector.load %arg5[%c3_44, %c0_45] : memref<4x32xf32, #tpu.memory_space<vmem>>, vector<1x32xf32>
    %105 = vector.broadcast %104 : vector<1x32xf32> to vector<4x32xf32>
    %106 = arith.mulf %70, %105 : vector<4x32xf32>
    %107 = arith.truncf %106 : vector<4x32xf32> to vector<4x32xbf16>
    %cst_46 = arith.constant dense<0.000000e+00> : vector<4x12xf32>
    %108 = tpu.matmul %107, %1, %cst_46 {dimension_numbers = #tpu.dot_dimension_numbers<[1], [1], [0], [0], [0, 0, 1, 0], [], []>} : vector<4x32xbf16>, vector<12x32xbf16>, vector<4x12xf32> -> vector<4x12xf32>
    %109 = vector.extract_strided_slice %69 {offsets = [0, 3], sizes = [4, 1], strides = [1, 1]} : vector<4x4xf32> to vector<4x1xf32>
    %110 = vector.broadcast %109 : vector<4x1xf32> to vector<4x12xf32>
    %111 = arith.addf %108, %110 : vector<4x12xf32>
    %c3_47 = arith.constant 3 : index
    %c0_48 = arith.constant 0 : index
    %112 = vector.load %arg7[%c3_47, %c0_48] : memref<4x12xf32, #tpu.memory_space<vmem>>, vector<1x12xf32>
    %113 = vector.broadcast %112 : vector<1x12xf32> to vector<4x12xf32>
    %114 = arith.addf %111, %113 : vector<4x12xf32>
    %115 = arith.maximumf %81, %92 : vector<4x12xf32>
    %116 = arith.maximumf %115, %103 : vector<4x12xf32>
    %117 = arith.maximumf %116, %114 : vector<4x12xf32>
    %118 = arith.subf %81, %117 : vector<4x12xf32>
    %c0_49 = arith.constant 0 : index
    %c0_50 = arith.constant 0 : index
    %c0_51 = arith.constant 0 : index
    %119 = vector.load %arg13[%c0_49, %c0_50, %c0_51] : memref<4x4x12xf32, #tpu.memory_space<vmem>>, vector<1x4x12xf32>
    %120 = vector.shape_cast %119 : vector<1x4x12xf32> to vector<4x12xf32>
    %121 = vector.shape_cast %118 : vector<4x12xf32> to vector<1x4x12xf32>
    tpu.vector_store %arg13[%c0_49, %c0_50, %c0_51], %121 {strides = array<i32>} : memref<4x4x12xf32, #tpu.memory_space<vmem>>, vector<1x4x12xf32>,
    %122 = arith.subf %92, %117 : vector<4x12xf32>
    %c1_52 = arith.constant 1 : index
    %c0_53 = arith.constant 0 : index
    %c0_54 = arith.constant 0 : index
    %123 = vector.load %arg13[%c1_52, %c0_53, %c0_54] : memref<4x4x12xf32, #tpu.memory_space<vmem>>, vector<1x4x12xf32>
    %124 = vector.shape_cast %123 : vector<1x4x12xf32> to vector<4x12xf32>
    %125 = vector.shape_cast %122 : vector<4x12xf32> to vector<1x4x12xf32>
    tpu.vector_store %arg13[%c1_52, %c0_53, %c0_54], %125 {strides = array<i32>} : memref<4x4x12xf32, #tpu.memory_space<vmem>>, vector<1x4x12xf32>,
    %126 = arith.subf %103, %117 : vector<4x12xf32>
    %c2_55 = arith.constant 2 : index
    %c0_56 = arith.constant 0 : index
    %c0_57 = arith.constant 0 : index
    %127 = vector.load %arg13[%c2_55, %c0_56, %c0_57] : memref<4x4x12xf32, #tpu.memory_space<vmem>>, vector<1x4x12xf32>
    %128 = vector.shape_cast %127 : vector<1x4x12xf32> to vector<4x12xf32>
    %129 = vector.shape_cast %126 : vector<4x12xf32> to vector<1x4x12xf32>
    tpu.vector_store %arg13[%c2_55, %c0_56, %c0_57], %129 {strides = array<i32>} : memref<4x4x12xf32, #tpu.memory_space<vmem>>, vector<1x4x12xf32>,
    %130 = arith.subf %114, %117 : vector<4x12xf32>
    %c3_58 = arith.constant 3 : index
    %c0_59 = arith.constant 0 : index
    %c0_60 = arith.constant 0 : index
    %131 = vector.load %arg13[%c3_58, %c0_59, %c0_60] : memref<4x4x12xf32, #tpu.memory_space<vmem>>, vector<1x4x12xf32>
    %132 = vector.shape_cast %131 : vector<1x4x12xf32> to vector<4x12xf32>
    %133 = vector.shape_cast %130 : vector<4x12xf32> to vector<1x4x12xf32>
    tpu.vector_store %arg13[%c3_58, %c0_59, %c0_60], %133 {strides = array<i32>} : memref<4x4x12xf32, #tpu.memory_space<vmem>>, vector<1x4x12xf32>,
    %c0_i32_61 = arith.constant 0 : i32
    %134 = vector.broadcast %c0_i32_61 : i32 to vector<4x12xi32>
    %135 = arith.cmpf ogt, %92, %81 : vector<4x12xf32>
    %c1_i32_62 = arith.constant 1 : i32
    %136 = vector.broadcast %c1_i32_62 : i32 to vector<4x12xi32>
    %137 = arith.select %135, %136, %134 : vector<4x12xi1>, vector<4x12xi32>
    %138 = arith.select %135, %92, %81 : vector<4x12xi1>, vector<4x12xf32>
    %139 = arith.cmpf ogt, %103, %138 : vector<4x12xf32>
    %c2_i32_63 = arith.constant 2 : i32
    %140 = vector.broadcast %c2_i32_63 : i32 to vector<4x12xi32>
    %141 = arith.select %139, %140, %137 : vector<4x12xi1>, vector<4x12xi32>
    %142 = arith.select %139, %103, %138 : vector<4x12xi1>, vector<4x12xf32>
    %143 = arith.cmpf ogt, %114, %142 : vector<4x12xf32>
    %c3_i32_64 = arith.constant 3 : i32
    %144 = vector.broadcast %c3_i32_64 : i32 to vector<4x12xi32>
    %145 = arith.select %143, %144, %141 : vector<4x12xi1>, vector<4x12xi32>
    %146 = arith.trunci %145 : vector<4x12xi32> to vector<4x12xi8>
    %c0_65 = arith.constant 0 : index
    %c0_66 = arith.constant 0 : index
    %147 = vector.load %arg14[%c0_65, %c0_66] : memref<4x12xi8, #tpu.memory_space<vmem>>, vector<4x12xi8>
    tpu.vector_store %arg14[%c0_65, %c0_66], %146 {strides = array<i32>} : memref<4x12xi8, #tpu.memory_space<vmem>>, vector<4x12xi8>,
    %c0_i32_67 = arith.constant 0 : i32
    %148 = vector.broadcast %c0_i32_67 : i32 to vector<4x12xi32>
    %149 = arith.cmpi eq, %145, %148 : vector<4x12xi32>
    %c0_68 = arith.constant 0 : index
    %c0_69 = arith.constant 0 : index
    %150 = vector.load %arg15[%c0_68, %c0_69] : memref<4x4xf32, #tpu.memory_space<vmem>>, vector<4x1xf32>
    %cst_70 = arith.constant 0.000000e+00 : f32
    %151 = vector.broadcast %cst_70 : f32 to vector<4x12xf32>
    %152 = arith.select %149, %5, %151 : vector<4x12xi1>, vector<4x12xf32>
    %cst_71 = arith.constant dense<0.000000e+00> : vector<4xf32>
    %153 = vector.multi_reduction <add>, %152, %cst_71 [1] : vector<4x12xf32> to vector<4xf32>
    %154 = vector.shape_cast %153 : vector<4xf32> to vector<4x1xf32>
    %155 = arith.addf %150, %154 : vector<4x1xf32>
    %c0_72 = arith.constant 0 : index
    %c0_73 = arith.constant 0 : index
    %156 = vector.load %arg15[%c0_72, %c0_73] : memref<4x4xf32, #tpu.memory_space<vmem>>, vector<4x1xf32>
    tpu.vector_store %arg15[%c0_72, %c0_73], %155 {strides = array<i32>} : memref<4x4xf32, #tpu.memory_space<vmem>>, vector<4x1xf32>,
    %c0_74 = arith.constant 0 : index
    %c0_75 = arith.constant 0 : index
    %157 = vector.load %arg16[%c0_74, %c0_75] : memref<4x4xf32, #tpu.memory_space<vmem>>, vector<4x1xf32>
    %158 = arith.extui %149 : vector<4x12xi1> to vector<4x12xi32>
    %159 = arith.sitofp %158 : vector<4x12xi32> to vector<4x12xf32>
    %cst_76 = arith.constant dense<0.000000e+00> : vector<4xf32>
    %160 = vector.multi_reduction <add>, %159, %cst_76 [1] : vector<4x12xf32> to vector<4xf32>
    %161 = vector.shape_cast %160 : vector<4xf32> to vector<4x1xf32>
    %162 = arith.addf %157, %161 : vector<4x1xf32>
    %c0_77 = arith.constant 0 : index
    %c0_78 = arith.constant 0 : index
    %163 = vector.load %arg16[%c0_77, %c0_78] : memref<4x4xf32, #tpu.memory_space<vmem>>, vector<4x1xf32>
    tpu.vector_store %arg16[%c0_77, %c0_78], %162 {strides = array<i32>} : memref<4x4xf32, #tpu.memory_space<vmem>>, vector<4x1xf32>,
    %c1_i32_79 = arith.constant 1 : i32
    %164 = vector.broadcast %c1_i32_79 : i32 to vector<4x12xi32>
    %165 = arith.cmpi eq, %145, %164 : vector<4x12xi32>
    %c0_80 = arith.constant 0 : index
    %c1_81 = arith.constant 1 : index
    %166 = vector.load %arg15[%c0_80, %c1_81] : memref<4x4xf32, #tpu.memory_space<vmem>>, vector<4x1xf32>
    %cst_82 = arith.constant 0.000000e+00 : f32
    %167 = vector.broadcast %cst_82 : f32 to vector<4x12xf32>
    %168 = arith.select %165, %5, %167 : vector<4x12xi1>, vector<4x12xf32>
    %cst_83 = arith.constant dense<0.000000e+00> : vector<4xf32>
    %169 = vector.multi_reduction <add>, %168, %cst_83 [1] : vector<4x12xf32> to vector<4xf32>
    %170 = vector.shape_cast %169 : vector<4xf32> to vector<4x1xf32>
    %171 = arith.addf %166, %170 : vector<4x1xf32>
    %c0_84 = arith.constant 0 : index
    %c1_85 = arith.constant 1 : index
    %172 = vector.load %arg15[%c0_84, %c1_85] : memref<4x4xf32, #tpu.memory_space<vmem>>, vector<4x1xf32>
    tpu.vector_store %arg15[%c0_84, %c1_85], %171 {strides = array<i32>} : memref<4x4xf32, #tpu.memory_space<vmem>>, vector<4x1xf32>,
    %c0_86 = arith.constant 0 : index
    %c1_87 = arith.constant 1 : index
    %173 = vector.load %arg16[%c0_86, %c1_87] : memref<4x4xf32, #tpu.memory_space<vmem>>, vector<4x1xf32>
    %174 = arith.extui %165 : vector<4x12xi1> to vector<4x12xi32>
    %175 = arith.sitofp %174 : vector<4x12xi32> to vector<4x12xf32>
    %cst_88 = arith.constant dense<0.000000e+00> : vector<4xf32>
    %176 = vector.multi_reduction <add>, %175, %cst_88 [1] : vector<4x12xf32> to vector<4xf32>
    %177 = vector.shape_cast %176 : vector<4xf32> to vector<4x1xf32>
    %178 = arith.addf %173, %177 : vector<4x1xf32>
    %c0_89 = arith.constant 0 : index
    %c1_90 = arith.constant 1 : index
    %179 = vector.load %arg16[%c0_89, %c1_90] : memref<4x4xf32, #tpu.memory_space<vmem>>, vector<4x1xf32>
    tpu.vector_store %arg16[%c0_89, %c1_90], %178 {strides = array<i32>} : memref<4x4xf32, #tpu.memory_space<vmem>>, vector<4x1xf32>,
    %c2_i32_91 = arith.constant 2 : i32
    %180 = vector.broadcast %c2_i32_91 : i32 to vector<4x12xi32>
    %181 = arith.cmpi eq, %145, %180 : vector<4x12xi32>
    %c0_92 = arith.constant 0 : index
    %c2_93 = arith.constant 2 : index
    %182 = vector.load %arg15[%c0_92, %c2_93] : memref<4x4xf32, #tpu.memory_space<vmem>>, vector<4x1xf32>
    %cst_94 = arith.constant 0.000000e+00 : f32
    %183 = vector.broadcast %cst_94 : f32 to vector<4x12xf32>
    %184 = arith.select %181, %5, %183 : vector<4x12xi1>, vector<4x12xf32>
    %cst_95 = arith.constant dense<0.000000e+00> : vector<4xf32>
    %185 = vector.multi_reduction <add>, %184, %cst_95 [1] : vector<4x12xf32> to vector<4xf32>
    %186 = vector.shape_cast %185 : vector<4xf32> to vector<4x1xf32>
    %187 = arith.addf %182, %186 : vector<4x1xf32>
    %c0_96 = arith.constant 0 : index
    %c2_97 = arith.constant 2 : index
    %188 = vector.load %arg15[%c0_96, %c2_97] : memref<4x4xf32, #tpu.memory_space<vmem>>, vector<4x1xf32>
    tpu.vector_store %arg15[%c0_96, %c2_97], %187 {strides = array<i32>} : memref<4x4xf32, #tpu.memory_space<vmem>>, vector<4x1xf32>,
    %c0_98 = arith.constant 0 : index
    %c2_99 = arith.constant 2 : index
    %189 = vector.load %arg16[%c0_98, %c2_99] : memref<4x4xf32, #tpu.memory_space<vmem>>, vector<4x1xf32>
    %190 = arith.extui %181 : vector<4x12xi1> to vector<4x12xi32>
    %191 = arith.sitofp %190 : vector<4x12xi32> to vector<4x12xf32>
    %cst_100 = arith.constant dense<0.000000e+00> : vector<4xf32>
    %192 = vector.multi_reduction <add>, %191, %cst_100 [1] : vector<4x12xf32> to vector<4xf32>
    %193 = vector.shape_cast %192 : vector<4xf32> to vector<4x1xf32>
    %194 = arith.addf %189, %193 : vector<4x1xf32>
    %c0_101 = arith.constant 0 : index
    %c2_102 = arith.constant 2 : index
    %195 = vector.load %arg16[%c0_101, %c2_102] : memref<4x4xf32, #tpu.memory_space<vmem>>, vector<4x1xf32>
    tpu.vector_store %arg16[%c0_101, %c2_102], %194 {strides = array<i32>} : memref<4x4xf32, #tpu.memory_space<vmem>>, vector<4x1xf32>,
    %c3_i32_103 = arith.constant 3 : i32
    %196 = vector.broadcast %c3_i32_103 : i32 to vector<4x12xi32>
    %197 = arith.cmpi eq, %145, %196 : vector<4x12xi32>
    %c0_104 = arith.constant 0 : index
    %c3_105 = arith.constant 3 : index
    %198 = vector.load %arg15[%c0_104, %c3_105] : memref<4x4xf32, #tpu.memory_space<vmem>>, vector<4x1xf32>
    %cst_106 = arith.constant 0.000000e+00 : f32
    %199 = vector.broadcast %cst_106 : f32 to vector<4x12xf32>
    %200 = arith.select %197, %5, %199 : vector<4x12xi1>, vector<4x12xf32>
    %cst_107 = arith.constant dense<0.000000e+00> : vector<4xf32>
    %201 = vector.multi_reduction <add>, %200, %cst_107 [1] : vector<4x12xf32> to vector<4xf32>
    %202 = vector.shape_cast %201 : vector<4xf32> to vector<4x1xf32>
    %203 = arith.addf %198, %202 : vector<4x1xf32>
    %c0_108 = arith.constant 0 : index
    %c3_109 = arith.constant 3 : index
    %204 = vector.load %arg15[%c0_108, %c3_109] : memref<4x4xf32, #tpu.memory_space<vmem>>, vector<4x1xf32>
    tpu.vector_store %arg15[%c0_108, %c3_109], %203 {strides = array<i32>} : memref<4x4xf32, #tpu.memory_space<vmem>>, vector<4x1xf32>,
    %c0_110 = arith.constant 0 : index
    %c3_111 = arith.constant 3 : index
    %205 = vector.load %arg16[%c0_110, %c3_111] : memref<4x4xf32, #tpu.memory_space<vmem>>, vector<4x1xf32>
    %206 = arith.extui %197 : vector<4x12xi1> to vector<4x12xi32>
    %207 = arith.sitofp %206 : vector<4x12xi32> to vector<4x12xf32>
    %cst_112 = arith.constant dense<0.000000e+00> : vector<4xf32>
    %208 = vector.multi_reduction <add>, %207, %cst_112 [1] : vector<4x12xf32> to vector<4xf32>
    %209 = vector.shape_cast %208 : vector<4xf32> to vector<4x1xf32>
    %210 = arith.addf %205, %209 : vector<4x1xf32>
    %c0_113 = arith.constant 0 : index
    %c3_114 = arith.constant 3 : index
    %211 = vector.load %arg16[%c0_113, %c3_114] : memref<4x4xf32, #tpu.memory_space<vmem>>, vector<4x1xf32>
    tpu.vector_store %arg16[%c0_113, %c3_114], %210 {strides = array<i32>} : memref<4x4xf32, #tpu.memory_space<vmem>>, vector<4x1xf32>,
    return
  }
  func.func @transform_0(%arg0: i32, %arg1: i32, %arg2: memref<4xf32, #tpu.memory_space<smem>>) -> (i32, i32) {
    %c0_i32 = arith.constant 0 : i32
    %c0_i32_0 = arith.constant 0 : i32
    return %arg0, %c0_i32 : i32, i32
  }
  func.func @transform_1(%arg0: i32, %arg1: i32, %arg2: memref<4xf32, #tpu.memory_space<smem>>) -> (i32, i32) {
    %c0_i32 = arith.constant 0 : i32
    %c0_i32_0 = arith.constant 0 : i32
    return %arg1, %c0_i32 : i32, i32
  }
  func.func @transform_2(%arg0: i32, %arg1: i32, %arg2: memref<4xf32, #tpu.memory_space<smem>>) -> (i32, i32) {
    %c0_i32 = arith.constant 0 : i32
    %c0_i32_0 = arith.constant 0 : i32
    %c0_i32_1 = arith.constant 0 : i32
    return %c0_i32, %c0_i32_0 : i32, i32
  }
  func.func @transform_3(%arg0: i32, %arg1: i32, %arg2: memref<4xf32, #tpu.memory_space<smem>>) -> (i32, i32) {
    %c0_i32 = arith.constant 0 : i32
    %c0_i32_0 = arith.constant 0 : i32
    return %arg0, %c0_i32 : i32, i32
  }
  func.func @transform_4(%arg0: i32, %arg1: i32, %arg2: memref<4xf32, #tpu.memory_space<smem>>) -> (i32, i32) {
    %c0_i32 = arith.constant 0 : i32
    %c0_i32_0 = arith.constant 0 : i32
    return %c0_i32, %arg1 : i32, i32
  }
  func.func @transform_5(%arg0: i32, %arg1: i32, %arg2: memref<4xf32, #tpu.memory_space<smem>>) -> (i32, i32) {
    %c0_i32 = arith.constant 0 : i32
    return %arg0, %arg1 : i32, i32
  }
  func.func @transform_6(%arg0: i32, %arg1: i32, %arg2: memref<4xf32, #tpu.memory_space<smem>>) -> (i32, i32) {
    %c0_i32 = arith.constant 0 : i32
    %c0_i32_0 = arith.constant 0 : i32
    return %arg0, %c0_i32 : i32, i32
  }
  func.func @transform_7(%arg0: i32, %arg1: i32, %arg2: memref<4xf32, #tpu.memory_space<smem>>) -> (i32, i32) {
    %c0_i32 = arith.constant 0 : i32
    %c0_i32_0 = arith.constant 0 : i32
    return %arg0, %c0_i32 : i32, i32
  }
  func.func @transform_8(%arg0: i32, %arg1: i32, %arg2: memref<4xf32, #tpu.memory_space<smem>>) -> (i32, i32) {
    %c0_i32 = arith.constant 0 : i32
    return %arg0, %arg1 : i32, i32
  }
  func.func @transform_9(%arg0: i32, %arg1: i32, %arg2: memref<4xf32, #tpu.memory_space<smem>>) -> (i32, i32) {
    %c0_i32 = arith.constant 0 : i32
    return %arg0, %arg1 : i32, i32
  }
  func.func @transform_10(%arg0: i32, %arg1: i32, %arg2: memref<4xf32, #tpu.memory_space<smem>>) -> (i32, i32, i32) {
    %c0_i32 = arith.constant 0 : i32
    %c0_i32_0 = arith.constant 0 : i32
    return %c0_i32, %arg0, %arg1 : i32, i32, i32
  }
  func.func @transform_11(%arg0: i32, %arg1: i32, %arg2: memref<4xf32, #tpu.memory_space<smem>>) -> (i32, i32) {
    %c0_i32 = arith.constant 0 : i32
    return %arg0, %arg1 : i32, i32
  }
  func.func @transform_12(%arg0: i32, %arg1: i32, %arg2: memref<4xf32, #tpu.memory_space<smem>>) -> (i32, i32) {
    %c0_i32 = arith.constant 0 : i32
    %c0_i32_0 = arith.constant 0 : i32
    return %arg0, %c0_i32 : i32, i32
  }
  func.func @transform_13(%arg0: i32, %arg1: i32, %arg2: memref<4xf32, #tpu.memory_space<smem>>) -> (i32, i32) {
    %c0_i32 = arith.constant 0 : i32
    %c0_i32_0 = arith.constant 0 : i32
    return %arg0, %c0_i32 : i32, i32
  }
}

</mosaic_0001>

<bundles_post_ra>
// kernel: tpu_custom_call.1
= control target key start
LH: loop header
LB: loop body
LE: loop exit
PB: predicated region body
PF: predicated region fallthrough
CT: control target
= control target key end

     0   :  { %s1265_s0 = inlined_call_operand.hbm [shape: f32[4], index: 0, kind: input, shape index: {}]   ;;  %s1266_s1 = inlined_call_operand.vmem [shape: bf16[4,32], index: 1, kind: input, shape index: {}]   ;;  %s1267_s2 = inlined_call_operand.hbm [shape: bf16[12,32], index: 2, kind: input, shape index: {}]   ;;  %s1268_s3 = inlined_call_operand.vmem [shape: f32[4,32], index: 3, kind: input, shape index: {}]   ;;  %s1269_s4 = inlined_call_operand.vmem [shape: f32[4,4], index: 4, kind: input, shape index: {}]   ;;  %s1270_s5 = inlined_call_operand.vmem [shape: f32[4,12], index: 5, kind: input, shape index: {}]   ;;  %s1271_s6 = inlined_call_operand.hbm [shape: f32[4,12], index: 6, kind: output, shape index: {0}]   ;;  %s1272_s7 = inlined_call_operand.vmem [shape: f32[4,1], index: 7, kind: output, shape index: {1}]   ;;  %s1273_s8 = inlined_call_operand.vmem [shape: f32[4,1], index: 8, kind: output, shape index: {2}]   ;;  %s1274_s9 = inlined_call_operand.hbm [shape: s8[4,12], index: 9, kind: output, shape index: {3}]   ;;  %s1275_s10 = inlined_call_operand.hbm [shape: s8[4,12], index: 10, kind: output, shape index: {4}]   ;;  %s1276_s11 = inlined_call_operand.hbm [shape: f32[4,4,12], index: 11, kind: output, shape index: {5}]   ;;  %s1277_s12 = inlined_call_operand.hbm [shape: s8[4,12], index: 12, kind: output, shape index: {6}]   ;;  %s1278_s13 = inlined_call_operand.hbm [shape: f32[4,4], index: 13, kind: output, shape index: {7}]   ;;  %s1279_s14 = inlined_call_operand.hbm [shape: f32[4,4], index: 14, kind: output, shape index: {8}]  }
   0x1   :  { %s712_s15 = scalar_lea.hbm %s1265_s0, 16 }
   0x2   :  { %p713_p0 = scmp.ne.s32.totalorder %s1265_s0, %s712_s15  ;;  %p716_p1 = scmp.lt.u32.totalorder %s712_s15, %s1265_s0 }
   0x4   :  { %p718_p2 = pnand %p716_p1, %p713_p0 }
   0x6   :  { %721 = shalt.err (!%p718_p2)  }
   0x7   :  { %s910_s20 = smov [#allocation4]  }
   0x8   :  { %21 = dma.hbm_to_smem %s1265_s0, 16, %s910_s20, [#allocation3] }
   0x9   :  { %898 = dma.done.wait [#allocation3], 16 }
   0xa   :  { %899 = vsyncadd [#allocation3], 4294967280 }
   0xb   :  { %23 = sfence }
   0xc   :  { %24 = vsyncpa [#allocation6], 0 }
   0xd   :  { %25 = vsyncpa [#allocation7], 0 }
   0xe   :  { %26 = vsyncpa [#allocation10], 0 }
   0xf   :  { %27 = vsyncpa [#allocation13], 0 }
  0x10   :  { %28 = vsyncpa [#allocation16], 0  ;;  %s911_s23 = smov [#allocation5]   ;;  %s722_s27 = scalar_lea.hbm %s1267_s2, 128 }
  0x11   :  { %s36_s24 = sshll.u32 %s911_s23, 4  ;;  %p723_p3 = scmp.ne.s32.totalorder %s1267_s2, %s722_s27  ;;  %s37_s24 = int_to_ptr.vmem [resolvable:$true] %s36_s24 }
  0x12   :  { %p726_p4 = scmp.lt.u32.totalorder %s722_s27, %s1267_s2 }
  0x14   :  { %p728_p5 = pnand %p726_p4, %p723_p3 }
  0x16   :  { %731 = shalt.err (!%p728_p5)
}
  0x17   :  { %s732_s15 = scalar_lea.vmem %s37_s24, 128  ;;  %p737_p7 = scmp.lt.s32.totalorder %s37_s24, %s37_s24 }
  0x18   :  { %p733_p6 = scmp.ne.s32.totalorder %s37_s24, %s732_s15  ;;  %p738_p8 = scmp.lt.s32.totalorder %s732_s15, %s732_s15 }
  0x1a   :  { %p739_p9 = por %p738_p8, %p737_p7 }
  0x1c   :  { %p740_p10 = pnand %p739_p9, %p733_p6 }
  0x1e   :  { %743 = shalt.err (!%p740_p10)
}
  0x1f   :  { %s912_s16 = smov 64   ;;  %s913_s17 = smov 4  }
  0x20   :  { %42 = dma.hbm_to_vmem [thread:$0]  %s1267_s2, 128, %s37_s24, [#allocation6], %s912_s16, %s912_s16, %s913_s17  }
  0x21   :  { %900 = dma.done.wait [#allocation6], 128  }
  0x22   :  { %901 = vsyncadd [#allocation6], 4294967168  ;;  %v914_v0 = vmov 0.0   ;;  %vm915_vm0 = vmmov 0   ;;  %v916_v1 = vmov 0   ;;  %v917_v2 = vmov 2  }
  0x23   :  { %658 = vmatprep.subr.bf16.mxu0 %v914_v0  ;;  %664 = vmatprep.subr.bf16.mxu1 %v914_v0  ;;  %vm71_vm1 = vcmask 261120   ;;  %v711_v3 = vld [vmem:[#allocation5] sm:$0x3f]   ;;  %v53_v4 = vld [vmem:[%s1266_s1] sm:$0x3]  ;;  %v918_v13 = vmov 1   ;;  %v166_v22 = vlaneseq }
  0x24   :  { %660 = vmatprep.mubr.msk.bf16.mxu0 %vm915_vm0, %v914_v0  ;;  %666 = vmatprep.mubr.msk.bf16.mxu1 %vm915_vm0, %v914_v0  ;;  %v632_v5 = vld [vmem:[%s1268_s3] ss:$0 sm:$0xff]  ;;  %v76_v6 = vsel %vm71_vm1, %v711_v3, 0  ;;  %v187_v7 = vunpack.c.l.bf16 %v53_v4  ;;  %v635_v11 = vld [vmem:[%s1268_s3 + $0x1] ss:$0 sm:$0xff]  ;;  %v919_v14 = vmov 3  }
  0x25   :  { %706 = vset.pattern.permute.xlu0 %v916_v1  ;;  %708 = vset.pattern.permute.xlu1 %v917_v2  ;;  %v186_v8 = vld [vmem:[%s1269_s4] sm:$0xf]  ;;  %vm60_vm2 = vcmask 3072   ;;  %vm63_vm3 = vcmask 27648   ;;  %s139_s0 = sld [smem:[#allocation4]]  ;;  %s629_s30 = sld [smem:[#allocation4 + $0x1]] }
  0x26   :  { %659 = vmatpush3.bf16.xpose.msra.mxu0 %v76_v6  ;;  %665 = vmatpush3.bf16.xpose.msra.mxu1 %v76_v6  ;;  %v193_v9 = vmul.f32 %v632_v5, %v187_v7  ;;  %v638_v12 = vld [vmem:[%s1268_s3 + $0x2] ss:$0 sm:$0xff]  ;;  %v254_v15 = vmul.f32 %v635_v11, %v187_v7  ;;  %v641_v19 = vld [vmem:[%s1268_s3 + $0x3] ss:$0 sm:$0xff]  ;;  %65 = vst.msk [vmem:[#allocation17] sm:$0xf] %vm63_vm3, %v914_v0 }
  0x27   :  { %670 = vmatprep.subr.bf16.mxu0 %v914_v0  ;;  %676 = vmatprep.subr.bf16.mxu1 %v914_v0  ;;  %v314_v16 = vmul.f32 %v638_v12, %v187_v7  ;;  %v374_v20 = vmul.f32 %v641_v19, %v187_v7  ;;  %62 = vst.msk [vmem:[%s1273_s8] sm:$0xf] %vm60_vm2, %v914_v0  ;;  %s630_s15 = sld [smem:[#allocation4 + $0x2]]  ;;  %s631_s18 = sld [smem:[#allocation4 + $0x3]]  ;;  %v1077_v23 = vshrl.u32 %v166_v22, 7  ;;  %v1079_v24 = vand.u32 127, %v166_v22 }
  0x28   :  { %197 = vperm.xlu0 %706, %v186_v8   ;;  %317 = vperm.xlu1 %708, %v186_v8   ;;  %v194_v10 = vpack.c.bf16 %v193_v9, %v193_v9  ;;  %v255_v17 = vpack.c.bf16 %v254_v15, %v254_v15  ;;  %64 = vst.msk [vmem:[#allocation15] sm:$0xf] %vm63_vm3, %v914_v0  ;;  %vm119_vm5 = vcmask 93184   ;;  %v634_v51 = vld [vmem:[%s1270_s5] ss:$0 sm:$0xff]  ;;  %vm137_vm10 = vcmask 90112  }
  0x29   :  { %v315_v18 = vpack.c.bf16 %v314_v16, %v314_v16  ;;  %v375_v21 = vpack.c.bf16 %v374_v20, %v374_v20  ;;  %vm176_vm4 = vcmp.eq.s32.totalorder %v1077_v23, %v1079_v24  ;;  %v637_v52 = vld [vmem:[%s1270_s5 + $0x1] ss:$0 sm:$0xff]  ;;  %v640_v58 = vld [vmem:[%s1270_s5 + $0x2] ss:$0 sm:$0xff]  ;;  %s921_s26 = smov [#allocation9]   ;;  %s922_s4 = smov [#allocation12]  }
  0x2a   :  { %s541_s27 = sshll.u32 %s921_s26, 4  ;;  %s560_s28 = sshll.u32 %s922_s4, 4  ;;  %s542_s27 = int_to_ptr.vmem [resolvable:$true] %s541_s27  ;;  %s1155_s28 = int_to_ptr.vmem [resolvable:$true] %s560_s28 }
  0x2b   :  { %v140_v26 = vstv %s139_s0  ;;  %v144_v27 = vstv %s629_s30  ;;  %s744_s3 = scalar_lea.vmem %s542_s27, 16  ;;  %s748_s29 = scalar_lea.vmem %s542_s27, 32 }
  0x2c   :  { %707 = vset.pattern.permute.xlu0 %v918_v13  ;;  %709 = vset.pattern.permute.xlu1 %v919_v14  ;;  %p745_p11 = scmp.ne.s32.totalorder %s542_s27, %s744_s3  ;;  %p749_p12 = scmp.lt.s32.totalorder %s542_s27, %s542_s27 }
  0x2d   :  { %661 = vmatmul.mubr.msk.bf16.vlgmr.msra.gmra.mrb[0].mxu0 %vm71_vm1, %v53_v4  ;;  %667 = vmatmul.mubr.msk.bf16.vlgmr.msra.gmra.mrb[0].mxu1 %vm71_vm1, %v194_v10  ;;  %v151_v28 = vstv %s630_s15  ;;  %v158_v34 = vstv %s631_s18  ;;  %p750_p13 = scmp.lt.s32.totalorder %s748_s29, %s744_s3 }
  0x2e   :  { %671 = vmatpush3.bf16.xpose.msra.mxu0 %v76_v6  ;;  %677 = vmatpush3.bf16.xpose.msra.mxu1 %v76_v6 }
  0x2f   :  { %672 = vmatprep.mubr.msk.bf16.mxu0 %vm915_vm0, %v914_v0  ;;  %682 = vmatprep.subr.bf16.mxu0 %v914_v0  ;;  %p751_p0 = por %p750_p13, %p749_p12 }
  0x30   :  { %678 = vmatprep.mubr.msk.bf16.mxu1 %vm915_vm0, %v914_v0  ;;  %257 = vperm.xlu0 %707, %v186_v8  }
  0x31   :  { %377 = vperm.xlu1 %709, %v186_v8   ;;  %p752_p1 = pnand %p751_p0, %p745_p11 }
  0x34   :  { %710 = vset.pattern.permute.xlu0 %v919_v14 }
  0x35   :  { %673 = vmatmul.mubr.msk.bf16.vlgmr.msra.gmra.mrb[4].mxu0 %vm71_vm1, %v255_v17  ;;  %679 = vmatmul.mubr.msk.bf16.vlgmr.msra.gmra.mrb[4].mxu1 %vm71_vm1, %v315_v18 }
  0x36   :  { %683 = vmatpush3.bf16.xpose.msra.mxu0 %v76_v6  ;;  %684 = vmatprep.mubr.msk.bf16.mxu0 %vm915_vm0, %v914_v0 }
  0x3d   :  { %685 = vmatmul.mubr.msk.bf16.vlgmr.msra.gmra.mrb[8].mxu0 %vm71_vm1, %v375_v21 }
  0xa7   :  { %v198_v25 = vpop.permute.xlu0 %197  ;;  %v318_v48 = vpop.permute.xlu1 %317 }
  0xaf   :  { %v258_v47 = vpop.permute.xlu0 %257 }
  0xb0   :  { %v378_v17 = vpop.permute.xlu1 %377 }
 0x100   :  { %v1083_v29 = vpop.f32.mrb[0].mxu0  ;;  %v237_v30 = vpop.f32.mrb[0].mxu1 }
 0x101   :  { %v662_v31 = vpop.f32.mrb[1].mxu0  ;;  %v668_v32 = vpop.f32.mrb[1].mxu1  ;;  %v184_v33 = vsel %vm176_vm4, 0.0, %v1083_v29  ;;  %v141_v37 = vsub.f32 %v1083_v29, %v140_v26  ;;  %v145_v38 = vsub.f32 %v1083_v29, %v144_v27  ;;  %v152_v39 = vsub.f32 %v1083_v29, %v151_v28  ;;  %v643_v26 = vld [vmem:[%s1270_s5 + $0x3] ss:$0 sm:$0xff] }
 0x102   :  { %v115_v35 = vpop.f32.mrb[2].mxu0  ;;  %v240_v36 = vpop.f32.mrb[2].mxu1  ;;  %185 = vst.msk [vmem:[#allocation8] sm:$0xf] %vm119_vm5, %v184_v33  ;;  %v126_v42 = vadd.f32 1.0, %v1083_v29  ;;  %v159_v45 = vsub.f32 %v1083_v29, %v158_v34  ;;  %v238_v50 = vadd.f32 %v237_v30, %v198_v25  ;;  %v178_v59 = vsel %vm176_vm4, %v1083_v29, 0.0 }
 0x103   :  { %v663_v40 = vpop.f32.mrb[3].mxu0  ;;  %v669_v41 = vpop.f32.mrb[3].mxu1  ;;  %v142_v43 = vand.u32 2147483647, %v141_v37  ;;  %v146_v44 = vand.u32 2147483647, %v145_v38 }
 0x104   :  { %v127_v46 = vmul.f32 0.5, %v126_v42  ;;  %v153_v49 = vand.u32 2147483647, %v152_v39  ;;  %v160_v60 = vand.u32 2147483647, %v159_v45  ;;  %v248_v8 = vadd.f32 %v634_v51, %v238_v50 }
 0x105   :  { %vm147_vm6 = vcmp.lt.f32.partialorder %v146_v44, %v142_v43 }
 0x106   :  { %v148_v53 = vsel %vm147_vm6, 1, %v916_v1  ;;  %v149_v54 = vsel %vm147_vm6, %v146_v44, %v142_v43  ;;  %v128_v55 = vmul.f32 4.0, %v127_v46 }
 0x107   :  { %vm1105_vm7 = vcmp.lt.f32.partialorder %v153_v49, %v149_v54 }
 0x108   :  { %v297_v56 = vpop.f32.mrb[4].mxu0  ;;  %v357_v57 = vpop.f32.mrb[4].mxu1  ;;  %v155_v3 = vsel %vm1105_vm7, 2, %v148_v53  ;;  %v156_v4 = vsel %vm1105_vm7, %v153_v49, %v149_v54  ;;  %v129_v7 = vfloor.f32 %v128_v55 }
 0x109   :  { %v298_v61 = vadd.f32 %v297_v56, %v258_v47  ;;  %v674_v62 = vpop.f32.mrb[5].mxu0  ;;  %v358_v63 = vadd.f32 %v357_v57, %v318_v48  ;;  %v680_v2 = vpop.f32.mrb[5].mxu1  ;;  %vm161_vm8 = vcmp.lt.f32.partialorder %v160_v60, %v156_v4  ;;  %v120_v60 = vsel %vm119_vm5, %v1083_v29, -inf }
 0x10a   :  { %v300_v5 = vpop.f32.mrb[6].mxu0  ;;  %v360_v6 = vpop.f32.mrb[6].mxu1  ;;  %v162_v13 = vsel %vm161_vm8, 3, %v155_v3  ;;  %v130_v15 = vtrunc.f32 %v129_v7  ;;  %v920_v62 = vmov -inf  }
 0x10b   :  { %v308_v9 = vadd.f32 %v637_v52, %v298_v61  ;;  %v368_v10 = vadd.f32 %v640_v58, %v358_v63  ;;  %v675_v11 = vpop.f32.mrb[7].mxu0  ;;  %v681_v12 = vpop.f32.mrb[7].mxu1  ;;  %v163_v14 = vpack.c.b16 %v162_v13, %v162_v13  ;;  %v179_v61 = vsel %vm119_vm5, %v178_v59, 0.0  ;;  %61 = vst.msk [vmem:[%s1272_s7] sm:$0xf] %vm60_vm2, %v920_v62 }
 0x10c   :  { %v131_v21 = vpack.c.f32.eXmY %v130_v15, %v130_v15, 312 }
 0x10d   :  { %v429_v16 = vmax.f32 %v248_v8, %v308_v9  ;;  %vm443_vm9 = vcmp.gt.f32.partialorder %v308_v9, %v248_v8  ;;  %v164_v20 = vpack.c.b8 %v163_v14, %v163_v14 }
 0x10e   :  { %v444_v18 = vsel %vm443_vm9, 1, %v916_v1  ;;  %v445_v19 = vsel %vm443_vm9, %v308_v9, %v248_v8  ;;  %v135_v30 = vpack.c.b8 %v131_v21, %v131_v21 }
 0x10f   :  { %v430_v22 = vmax.f32 %v429_v16, %v368_v10  ;;  %vm446_vm11 = vcmp.gt.f32.partialorder %v368_v10, %v445_v19  ;;  %165 = vst.msk [vmem:[#allocation9] sm:$0x1] %vm137_vm10, %v164_v20 }
 0x110   :  { %v417_v25 = vpop.f32.mrb[8].mxu0  ;;  %v447_v27 = vsel %vm446_vm11, 2, %v444_v18  ;;  %v448_v28 = vsel %vm446_vm11, %v368_v10, %v445_v19  ;;  %138 = vst.msk [vmem:[#allocation11] sm:$0x1] %vm137_vm10, %v135_v30 }
 0x111   :  { %v418_v31 = vadd.f32 %v417_v25, %v378_v17  ;;  %v686_v32 = vpop.f32.mrb[9].mxu0 }
 0x112   :  { %v420_v33 = vpop.f32.mrb[10].mxu0 }
 0x113   :  { %v428_v1 = vadd.f32 %v643_v26, %v418_v31  ;;  %v687_v34 = vpop.f32.mrb[11].mxu0 }
 0x115   :  { %v431_v35 = vmax.f32 %v430_v22, %v428_v1  ;;  %vm449_vm12 = vcmp.gt.f32.partialorder %v428_v1, %v448_v28 }
 0x116   :  { %v450_v36 = vsel %vm449_vm12, 3, %v447_v27 }
 0x117   :  { %v440_v37 = vsub.f32 %v428_v1, %v431_v35  ;;  %vm454_vm13 = vcmp.eq.s32.totalorder %v450_v36, 0  ;;  %vm470_vm14 = vcmp.eq.s32.totalorder %v450_v36, 1  ;;  %vm487_vm15 = vcmp.eq.s32.totalorder %v450_v36, 2 }
 0x118   :  { %v644_v38 = vsel %vm454_vm13, 1.0, %v914_v0  ;;  %v456_v39 = vsel %vm454_vm13, %v1083_v29, 0.0  ;;  %v472_v40 = vsel %vm470_vm14, %v1083_v29, 0.0  ;;  %v645_v43 = vsel %vm470_vm14, 1.0, %v914_v0 }
 0x119   :  { %v465_v41 = vsel %vm119_vm5, %v644_v38, 0.0  ;;  %442 = vst.msk [vmem:[#allocation12 + $0xc] sm:$0xf] %vm119_vm5, %v440_v37  ;;  %v457_v42 = vsel %vm119_vm5, %v456_v39, 0.0  ;;  %v489_v44 = vsel %vm487_vm15, %v1083_v29, 0.0  ;;  %vm504_vm0 = vcmp.eq.s32.totalorder %v450_v36, 3 }
 0x11a   :  { %466 = vadd.xlane.f32.xlu0 %v465_v41  ;;  %458 = vadd.xlane.f32.xlu1 %v457_v42  ;;  %v432_v45 = vsub.f32 %v248_v8, %v431_v35  ;;  %v506_v46 = vsel %vm504_vm0, %v1083_v29, 0.0  ;;  %v434_v47 = vsub.f32 %v308_v9, %v431_v35  ;;  %v437_v48 = vsub.f32 %v368_v10, %v431_v35 }
 0x11b   :  { %v473_v49 = vsel %vm119_vm5, %v472_v40, 0.0  ;;  %v482_v50 = vsel %vm119_vm5, %v645_v43, 0.0  ;;  %v451_v51 = vpack.c.b16 %v450_v36, %v450_v36  ;;  %v646_v52 = vsel %vm487_vm15, 1.0, %v914_v0 }
 0x11c   :  { %433 = vst.msk [vmem:[#allocation12] sm:$0xf] %vm119_vm5, %v432_v45  ;;  %436 = vst.msk [vmem:[#allocation12 + $0x4] sm:$0xf] %vm119_vm5, %v434_v47  ;;  %v490_v54 = vsel %vm119_vm5, %v489_v44, 0.0  ;;  %v499_v55 = vsel %vm119_vm5, %v646_v52, 0.0 }
 0x11d   :  { %439 = vst.msk [vmem:[#allocation12 + $0x8] sm:$0xf] %vm119_vm5, %v437_v48  ;;  %v452_v53 = vpack.c.b8 %v451_v51, %v451_v51  ;;  %v647_v56 = vsel %vm504_vm0, 1.0, %v914_v0  ;;  %v507_v57 = vsel %vm119_vm5, %v506_v46, 0.0 }
 0x11e   :  { %474 = vadd.xlane.f32.xlu0 %v473_v49  ;;  %483 = vadd.xlane.f32.xlu1 %v482_v50  ;;  %v516_v58 = vsel %vm119_vm5, %v647_v56, 0.0 }
 0x11f   :  { %453 = vst.msk [vmem:[#allocation14] sm:$0x1] %vm137_vm10, %v452_v53 }
 0x122   :  { %491 = vadd.xlane.f32.xlu0 %v490_v54  ;;  %500 = vadd.xlane.f32.xlu1 %v499_v55 }
 0x126   :  { %508 = vadd.xlane.f32.xlu0 %v507_v57  ;;  %517 = vadd.xlane.f32.xlu1 %v516_v58 }
 0x12a   :  { %121 = vmax.xlane.f32.xlu0 %v120_v60  ;;  %180 = vadd.xlane.f32.xlu1 %v179_v61 }
 0x12b   :  { %755 = shalt.err (!%p752_p1)
}
 0x12c   :  { %s756_s15 = scalar_lea.hbm %s1274_s9, 16 }
 0x12d   :  { %p757_p2 = scmp.ne.s32.totalorder %s1274_s9, %s756_s15  ;;  %p760_p3 = scmp.lt.u32.totalorder %s756_s15, %s1274_s9 }
 0x12f   :  { %p762_p4 = pnand %p760_p3, %p757_p2 }
 0x131   :  { %765 = shalt.err (!%p762_p4)
}
 0x132   :  { %544 = dma.vmem_to_hbm [thread:$0]  %s542_s27, 16, %s1274_s9, [#allocation10]  }
 0x133   :  { %s766_s23 = scalar_lea.vmem %s1155_s28, 256  ;;  %p771_p6 = scmp.lt.s32.totalorder %s1155_s28, %s1155_s28 }
 0x134   :  { %p767_p5 = scmp.ne.s32.totalorder %s1155_s28, %s766_s23  ;;  %p772_p7 = scmp.lt.s32.totalorder %s766_s23, %s766_s23 }
 0x136   :  { %p773_p8 = por %p772_p7, %p771_p6 }
 0x138   :  { %p774_p9 = pnand %p773_p8, %p767_p5 }
 0x13a   :  { %777 = shalt.err (!%p774_p9)
}
 0x13b   :  { %s778_s5 = scalar_lea.hbm %s1276_s11, 256 }
 0x13c   :  { %p779_p10 = scmp.ne.s32.totalorder %s1276_s11, %s778_s5  ;;  %p782_p11 = scmp.lt.u32.totalorder %s778_s5, %s1276_s11 }
 0x13e   :  { %p784_p12 = pnand %p782_p11, %p779_p10 }
 0x140   :  { %787 = shalt.err (!%p784_p12)
}
 0x141   :  { %566 = dma.vmem_to_hbm [thread:$0]  %s1155_s28, 256, %s1276_s11, [#allocation13], %s912_s16, %s912_s16, %s913_s17  }
 0x142   :  { %s923_s29 = smov [#allocation8]  }
 0x143   :  { %s527_s0 = sshll.u32 %s923_s29, 4  ;;  %s528_s0 = int_to_ptr.vmem [resolvable:$true] %s527_s0 }
 0x144   :  { %s788_s30 = scalar_lea.vmem %s528_s0, 64  ;;  %p793_p0 = scmp.lt.s32.totalorder %s528_s0, %s528_s0 }
 0x145   :  { %p789_p13 = scmp.ne.s32.totalorder %s528_s0, %s788_s30  ;;  %p794_p1 = scmp.lt.s32.totalorder %s788_s30, %s788_s30 }
 0x147   :  { %p795_p2 = por %p794_p1, %p793_p0 }
 0x149   :  { %p796_p3 = pnand %p795_p2, %p789_p13 }
 0x14b   :  { %799 = shalt.err (!%p796_p3)
}
 0x14c   :  { %s800_s19 = scalar_lea.hbm %s1271_s6, 64 }
 0x14d   :  { %p801_p4 = scmp.ne.s32.totalorder %s1271_s6, %s800_s19  ;;  %p804_p5 = scmp.lt.u32.totalorder %s800_s19, %s1271_s6 }
 0x14f   :  { %p806_p6 = pnand %p804_p5, %p801_p4 }
 0x151   :  { %809 = shalt.err (!%p806_p6)
}
 0x152   :  { %530 = dma.vmem_to_hbm [thread:$0]  %s528_s0, 64, %s1271_s6, [#allocation7]  }
 0x153   :  { %s924_s28 = smov [#allocation11]   ;;  %s925_s23 = smov [#allocation14]  }
 0x154   :  { %s551_s22 = sshll.u32 %s924_s28, 4  ;;  %s573_s24 = sshll.u32 %s925_s23, 4  ;;  %s552_s22 = int_to_ptr.vmem [resolvable:$true] %s551_s22  ;;  %s574_s24 = int_to_ptr.vmem [resolvable:$true] %s573_s24 }
 0x155   :  { %s810_s1 = scalar_lea.vmem %s552_s22, 16  ;;  %s814_s5 = scalar_lea.vmem %s552_s22, 32 }
 0x156   :  { %p811_p7 = scmp.ne.s32.totalorder %s552_s22, %s810_s1  ;;  %p815_p8 = scmp.lt.s32.totalorder %s552_s22, %s552_s22 }
 0x157   :  { %p816_p9 = scmp.lt.s32.totalorder %s814_s5, %s810_s1 }
 0x159   :  { %p817_p10 = por %p816_p9, %p815_p8 }
 0x15b   :  { %p818_p11 = pnand %p817_p10, %p811_p7 }
 0x15d   :  { %821 = shalt.err (!%p818_p11)
}
 0x15e   :  { %s822_s4 = scalar_lea.hbm %s1275_s10, 16 }
 0x15f   :  { %p823_p12 = scmp.ne.s32.totalorder %s1275_s10, %s822_s4  ;;  %p826_p13 = scmp.lt.u32.totalorder %s822_s4, %s1275_s10 }
 0x161   :  { %p828_p0 = pnand %p826_p13, %p823_p12 }
 0x163   :  { %831 = shalt.err (!%p828_p0)
}
 0x164   :  { %554 = dma.vmem_to_hbm [thread:$0]  %s552_s22, 16, %s1275_s10, [#allocation10]  }
 0x165   :  { %s832_s30 = scalar_lea.vmem %s574_s24, 16  ;;  %s836_s15 = scalar_lea.vmem %s574_s24, 32 }
 0x166   :  { %p833_p1 = scmp.ne.s32.totalorder %s574_s24, %s832_s30  ;;  %p837_p2 = scmp.lt.s32.totalorder %s574_s24, %s574_s24 }
 0x167   :  { %p838_p3 = scmp.lt.s32.totalorder %s836_s15, %s832_s30 }
 0x169   :  { %p839_p4 = por %p838_p3, %p837_p2 }
 0x16b   :  { %p840_p5 = pnand %p839_p4, %p833_p1 }
 0x16d   :  { %843 = shalt.err (!%p840_p5)
}
 0x16e   :  { %s844_s2 = scalar_lea.hbm %s1277_s12, 16 }
 0x16f   :  { %p845_p6 = scmp.ne.s32.totalorder %s1277_s12, %s844_s2  ;;  %p848_p7 = scmp.lt.u32.totalorder %s844_s2, %s1277_s12 }
 0x171   :  { %p850_p8 = pnand %p848_p7, %p845_p6 }
 0x173   :  { %853 = shalt.err (!%p850_p8)
}
 0x174   :  { %576 = dma.vmem_to_hbm [thread:$0]  %s574_s24, 16, %s1277_s12, [#allocation13]   ;;  %v462_v0 = vld [vmem:[#allocation17] sm:$0xf]  ;;  %v455_v23 = vld [vmem:[#allocation15] sm:$0xf] }
 0x175   :  { %vm477_vm1 = vcmask 11272   ;;  %v118_v13 = vld [vmem:[%s1272_s7] sm:$0xf]  ;;  %vm494_vm3 = vcmask 19472   ;;  %s926_s26 = smov [#allocation15]   ;;  %s927_s3 = smov [#allocation17]  }
 0x176   :  { %v177_v14 = vld [vmem:[%s1273_s8] sm:$0xf]  ;;  %s583_s4 = sshll.u32 %s926_s26, 4  ;;  %s593_s6 = sshll.u32 %s927_s3, 4  ;;  %vm511_vm4 = vcmask 27672   ;;  %s584_s4 = int_to_ptr.vmem [resolvable:$true] %s583_s4  ;;  %s594_s6 = int_to_ptr.vmem [resolvable:$true] %s593_s6 }
 0x177   :  { %p859_p10 = scmp.lt.s32.totalorder %s584_s4, %s584_s4 }
 0x1a7   :  { %v467_v24 = vpop.xlane.xlu0 %466  ;;  %v459_v29 = vpop.xlane.xlu1 %458 }
 0x1a8   :  { %v468_v63 = vadd.f32 %v467_v24, %v462_v0  ;;  %v460_v2 = vadd.f32 %v459_v29, %v455_v23 }
 0x1aa   :  { %469 = vst.msk [vmem:[#allocation17] sm:$0xf] %vm60_vm2, %v468_v63  ;;  %461 = vst.msk [vmem:[#allocation15] sm:$0xf] %vm60_vm2, %v460_v2 }
 0x1ab   :  { %v475_v3 = vpop.xlane.xlu0 %474  ;;  %v484_v4 = vpop.xlane.xlu1 %483 }
 0x1af   :  { %v492_v5 = vpop.xlane.xlu0 %491  ;;  %v501_v6 = vpop.xlane.xlu1 %500 }
 0x1b1   :  { %v471_v7 = vld [vmem:[#allocation15] sm:$0xf]  ;;  %v479_v8 = vld [vmem:[#allocation17] sm:$0xf] }
 0x1b2   :  { %v476_v9 = vadd.f32 %v475_v3, %v471_v7  ;;  %v485_v10 = vadd.f32 %v484_v4, %v479_v8 }
 0x1b3   :  { %v509_v11 = vpop.xlane.xlu0 %508  ;;  %v518_v12 = vpop.xlane.xlu1 %517 }
 0x1b4   :  { %478 = vst.msk [vmem:[#allocation15] sm:$0xf] %vm477_vm1, %v476_v9  ;;  %486 = vst.msk [vmem:[#allocation17] sm:$0xf] %vm477_vm1, %v485_v10 }
 0x1b7   :  { %v122_v15 = vpop.xlane.xlu0 %121  ;;  %v181_v16 = vpop.xlane.xlu1 %180 }
 0x1b8   :  { %v123_v17 = vmax.f32 %v118_v13, %v122_v15  ;;  %v182_v18 = vadd.f32 %v181_v16, %v177_v14 }
 0x1ba   :  { %125 = vst.msk [vmem:[%s1272_s7] sm:$0xf] %vm60_vm2, %v123_v17  ;;  %183 = vst.msk [vmem:[%s1273_s8] sm:$0xf] %vm60_vm2, %v182_v18  ;;  %s854_s7 = scalar_lea.vmem %s584_s4, 64 }
 0x1bb   :  { %v488_v19 = vld [vmem:[#allocation15] sm:$0xf]  ;;  %v496_v20 = vld [vmem:[#allocation17] sm:$0xf]  ;;  %p855_p9 = scmp.ne.s32.totalorder %s584_s4, %s854_s7  ;;  %p860_p11 = scmp.lt.s32.totalorder %s854_s7, %s854_s7 }
 0x1bc   :  { %v493_v21 = vadd.f32 %v492_v5, %v488_v19  ;;  %v502_v22 = vadd.f32 %v501_v6, %v496_v20 }
 0x1bd   :  { %p861_p12 = por %p860_p11, %p859_p10 }
 0x1be   :  { %495 = vst.msk [vmem:[#allocation15] sm:$0xf] %vm494_vm3, %v493_v21  ;;  %503 = vst.msk [vmem:[#allocation17] sm:$0xf] %vm494_vm3, %v502_v22 }
 0x1bf   :  { %p862_p13 = pnand %p861_p12, %p855_p9 }
 0x1c5   :  { %v505_v25 = vld [vmem:[#allocation15] sm:$0xf]  ;;  %v513_v26 = vld [vmem:[#allocation17] sm:$0xf] }
 0x1c6   :  { %v510_v27 = vadd.f32 %v509_v11, %v505_v25  ;;  %v519_v28 = vadd.f32 %v518_v12, %v513_v26 }
 0x1c8   :  { %512 = vst.msk [vmem:[#allocation15] sm:$0xf] %vm511_vm4, %v510_v27  ;;  %520 = vst.msk [vmem:[#allocation17] sm:$0xf] %vm511_vm4, %v519_v28 }
 0x1c9   :  { %865 = shalt.err (!%p862_p13)
}
 0x1ca   :  { %s866_s27 = scalar_lea.hbm %s1278_s13, 64 }
 0x1cb   :  { %p867_p0 = scmp.ne.s32.totalorder %s1278_s13, %s866_s27  ;;  %p870_p1 = scmp.lt.u32.totalorder %s866_s27, %s1278_s13 }
 0x1cd   :  { %p872_p2 = pnand %p870_p1, %p867_p0 }
 0x1cf   :  { %875 = shalt.err (!%p872_p2)
}
 0x1d0   :  { %586 = dma.vmem_to_hbm [thread:$0]  %s584_s4, 64, %s1278_s13, [#allocation16]  }
 0x1d1   :  { %s876_s2 = scalar_lea.vmem %s594_s6, 64  ;;  %p881_p4 = scmp.lt.s32.totalorder %s594_s6, %s594_s6 }
 0x1d2   :  { %p877_p3 = scmp.ne.s32.totalorder %s594_s6, %s876_s2  ;;  %p882_p5 = scmp.lt.s32.totalorder %s876_s2, %s876_s2 }
 0x1d4   :  { %p883_p6 = por %p882_p5, %p881_p4 }
 0x1d6   :  { %p884_p7 = pnand %p883_p6, %p877_p3 }
 0x1d8   :  { %887 = shalt.err (!%p884_p7)
}
 0x1d9   :  { %s888_s11 = scalar_lea.hbm %s1279_s14, 64 }
 0x1da   :  { %p889_p8 = scmp.ne.s32.totalorder %s1279_s14, %s888_s11  ;;  %p892_p9 = scmp.lt.u32.totalorder %s888_s11, %s1279_s14 }
 0x1dc   :  { %p894_p10 = pnand %p892_p9, %p889_p8 }
 0x1de   :  { %897 = shalt.err (!%p894_p10)
}
 0x1df   :  { %596 = dma.vmem_to_hbm [thread:$0]  %s594_s6, 64, %s1279_s14, [#allocation16]  }
 0x1e0   :  { %902 = dma.done.wait [#allocation7], 64  }
 0x1e1   :  { %903 = vsyncadd [#allocation7], 4294967232 }
 0x1e2   :  { %904 = dma.done.wait [#allocation10], 32  }
 0x1e3   :  { %905 = vsyncadd [#allocation10], 4294967264 }
 0x1e4   :  { %906 = dma.done.wait [#allocation13], 272  }
 0x1e5   :  { %907 = vsyncadd [#allocation13], 4294967024 }
 0x1e6   :  { %908 = dma.done.wait [#allocation16], 128  }
 0x1e7   :  { %909 = vsyncadd [#allocation16], 4294967168 }
 0x1e8   :  { %622 = vsyncpa [#allocation6], 1 }
 0x1e9   :  { %623 = vsyncpa [#allocation7], 1 }
 0x1ea   :  { %624 = vsyncpa [#allocation10], 1 }
 0x1eb   :  { %625 = vsyncpa [#allocation13], 1 }
 0x1ec   :  { %626 = vsyncpa [#allocation16], 1 }

</bundles_post_ra>
